<compile_context>
chip_gen: v6e
topology: v6e:2x2x1
jax: 0.10.0
libtpu: 0.0.40
codegen_flags: <defaults>
</compile_context>

<pallas_src>
import functools

import jax
import jax.numpy as jnp
from jax.experimental import pallas as pl
from jax.experimental.pallas import tpu as pltpu

KH = 3
KW = 3
LANE = 128


def _round_up(v, m):
    return (v + m - 1) // m * m


def conv_taps_kernel(x_ref, w_ref, o_ref, *, img_w):
    # x_ref: (Cin+1, MF + halo) f32  channel-major flat activations; row Cin
    #        is the all-ones bias row.  Lane padding only feeds output
    #        columns the wrapper discards, so its value is irrelevant.
    # w_ref: (KH*KW, Cout, Cin+1) f32  per-tap weight matrices; the bias sits
    #        in tap 0's last input-channel column.
    # o_ref: (Cout, MF) f32  full-grid (incl. invalid) output columns,
    #        lane-dense (MF is a multiple of 128 -> unmasked stores).
    mf = o_ref.shape[-1]
    acc = None
    for kh in range(KH):
        for kw in range(KW):
            off = kh * img_w + kw                   # static lane offset
            xs = x_ref[:, pl.ds(off, mf)]           # shifted window (Cin+1, MF)
            part = jnp.dot(w_ref[kh * KW + kw], xs,
                           preferred_element_type=jnp.float32)
            acc = part if acc is None else acc + part
    o_ref[...] = acc.astype(o_ref.dtype)


@jax.jit
def conv2d_pallas(x, w, b):
    n, cin, h, img_w = x.shape
    cout = w.shape[0]
    hout = h - KH + 1
    wout = img_w - KW + 1

    m = n * h * img_w                       # full-grid columns (incl. invalid)
    mf = _round_up(m, LANE)                 # lane-aligned output width
    halo = _round_up((KH - 1) * img_w + (KW - 1), LANE)

    # Channel-major flat activations + one all-ones row (bias) + lane pad.
    # Pure layout plumbing, no data duplication (contrast: 9x im2col).
    # Padding with 1.0 is harmless: valid output columns never read the pad.
    x_cf = jnp.transpose(x, (1, 0, 2, 3)).reshape(cin, m).astype(jnp.float32)
    x_aug = jnp.pad(x_cf, ((0, 1), (0, mf + halo - m)), constant_values=1.0)

    # Per-tap weight matrices (KH*KW, Cout, Cin+1); bias folded into tap 0.
    w_flat = jnp.transpose(w, (2, 3, 0, 1)).reshape(KH * KW, cout, cin)
    w_taps = jnp.pad(w_flat.astype(jnp.float32), ((0, 0), (0, 0), (0, 1)))
    w_taps = w_taps.at[0, :, cin].set(b.astype(jnp.float32))

    flops = 2 * cout * (cin + 1) * KH * KW * mf
    bytes_accessed = x_aug.size * 4 + w_taps.size * 4 + cout * mf * 4

    out_full = pl.pallas_call(
        functools.partial(conv_taps_kernel, img_w=img_w),
        out_shape=jax.ShapeDtypeStruct((cout, mf), jnp.float32),
        in_specs=[
            pl.BlockSpec(memory_space=pltpu.MemorySpace.VMEM),
            pl.BlockSpec(memory_space=pltpu.MemorySpace.VMEM),
        ],
        out_specs=pl.BlockSpec(memory_space=pltpu.MemorySpace.VMEM),
        cost_estimate=pl.CostEstimate(flops=flops, transcendentals=0,
                                      bytes_accessed=bytes_accessed),
    )(x_aug, w_taps)

    # Keep only valid conv columns; pure layout plumbing on the output.
    out = out_full[:, :m].reshape(cout, n, h, img_w)[:, :, :hout, :wout]
    return jnp.transpose(out, (1, 0, 2, 3)).astype(x.dtype)


if __name__ == "__main__":
    key = jax.random.PRNGKey(0)
    kx, kwgt, kb = jax.random.split(key, 3)

    # small shapes consistent with the module: N=2, Cin=Cout=3, H=W=16
    N, CIN, COUT, H, W = 2, 3, 3, 16, 16
    x = jax.random.normal(kx, (N, CIN, H, W), dtype=jnp.float32)

    # deterministic init matching PyTorch Conv2d default:
    # U(-1/sqrt(fan_in), 1/sqrt(fan_in)), fan_in = Cin*KH*KW
    fan_in = CIN * KH * KW
    bound = 1.0 / jnp.sqrt(jnp.float32(fan_in))
    w = jax.random.uniform(kwgt, (COUT, CIN, KH, KW), jnp.float32, -bound, bound)
    b = jax.random.uniform(kb, (COUT,), jnp.float32, -bound, bound)

    out = jax.block_until_ready(conv2d_pallas(x, w, b))

    # reference check against XLA conv (f32 HIGHEST)
    ref = jax.lax.conv_general_dilated(
        x, w, window_strides=(1, 1), padding="VALID",
        dimension_numbers=("NCHW", "OIHW", "NCHW"),
        precision=jax.lax.Precision.HIGHEST,
    ) + b[None, :, None, None]

    assert out.shape == (N, COUT, H - KH + 1, W - KW + 1)
    # Kernel uses default (bf16-pass) MXU precision per the perf review, so the
    # tolerance is loosened consistently vs the f32 HIGHEST reference.
    assert jnp.allclose(out, ref, atol=2e-2, rtol=2e-2), float(
        jnp.max(jnp.abs(out - ref)))

    print("KERNEL_OK")
</pallas_src>

<mosaic_0001>
module attributes {stable_mosaic.version = 11 : i64} {
  func.func @conv_taps_kernel(%arg0: memref<4x640xf32, #tpu.memory_space<vmem>>, %arg1: memref<9x3x4xf32, #tpu.memory_space<vmem>>, %arg2: memref<3x512xf32, #tpu.memory_space<vmem>>) attributes {dimension_semantics = [], scalar_prefetch = 0 : i64, scratch_operands = 0 : i64, tpu.core_type = #tpu.core_type<tc>} {
    %c0 = arith.constant 0 : index
    %c0_0 = arith.constant 0 : index
    %0 = vector.load %arg0[%c0, %c0_0] : memref<4x640xf32, #tpu.memory_space<vmem>>, vector<4x512xf32>
    %c0_1 = arith.constant 0 : index
    %c0_2 = arith.constant 0 : index
    %c0_3 = arith.constant 0 : index
    %1 = vector.load %arg1[%c0_1, %c0_2, %c0_3] : memref<9x3x4xf32, #tpu.memory_space<vmem>>, vector<1x3x4xf32>
    %2 = vector.shape_cast %1 : vector<1x3x4xf32> to vector<3x4xf32>
    %cst = arith.constant dense<0.000000e+00> : vector<3x512xf32>
    %3 = tpu.matmul %2, %0, %cst {dimension_numbers = #tpu.dot_dimension_numbers<[1], [0], [0], [1], [0, 0, 1, 1], [], []>} : vector<3x4xf32>, vector<4x512xf32>, vector<3x512xf32> -> vector<3x512xf32>
    %c0_4 = arith.constant 0 : index
    %c1 = arith.constant 1 : index
    %4 = vector.load %arg0[%c0_4, %c1] : memref<4x640xf32, #tpu.memory_space<vmem>>, vector<4x512xf32>
    %c1_5 = arith.constant 1 : index
    %c0_6 = arith.constant 0 : index
    %c0_7 = arith.constant 0 : index
    %5 = vector.load %arg1[%c1_5, %c0_6, %c0_7] : memref<9x3x4xf32, #tpu.memory_space<vmem>>, vector<1x3x4xf32>
    %6 = vector.shape_cast %5 : vector<1x3x4xf32> to vector<3x4xf32>
    %cst_8 = arith.constant dense<0.000000e+00> : vector<3x512xf32>
    %7 = tpu.matmul %6, %4, %cst_8 {dimension_numbers = #tpu.dot_dimension_numbers<[1], [0], [0], [1], [0, 0, 1, 1], [], []>} : vector<3x4xf32>, vector<4x512xf32>, vector<3x512xf32> -> vector<3x512xf32>
    %8 = arith.addf %3, %7 : vector<3x512xf32>
    %c0_9 = arith.constant 0 : index
    %c2 = arith.constant 2 : index
    %9 = vector.load %arg0[%c0_9, %c2] : memref<4x640xf32, #tpu.memory_space<vmem>>, vector<4x512xf32>
    %c2_10 = arith.constant 2 : index
    %c0_11 = arith.constant 0 : index
    %c0_12 = arith.constant 0 : index
    %10 = vector.load %arg1[%c2_10, %c0_11, %c0_12] : memref<9x3x4xf32, #tpu.memory_space<vmem>>, vector<1x3x4xf32>
    %11 = vector.shape_cast %10 : vector<1x3x4xf32> to vector<3x4xf32>
    %cst_13 = arith.constant dense<0.000000e+00> : vector<3x512xf32>
    %12 = tpu.matmul %11, %9, %cst_13 {dimension_numbers = #tpu.dot_dimension_numbers<[1], [0], [0], [1], [0, 0, 1, 1], [], []>} : vector<3x4xf32>, vector<4x512xf32>, vector<3x512xf32> -> vector<3x512xf32>
    %13 = arith.addf %8, %12 : vector<3x512xf32>
    %c0_14 = arith.constant 0 : index
    %c16 = arith.constant 16 : index
    %14 = vector.load %arg0[%c0_14, %c16] : memref<4x640xf32, #tpu.memory_space<vmem>>, vector<4x512xf32>
    %c3 = arith.constant 3 : index
    %c0_15 = arith.constant 0 : index
    %c0_16 = arith.constant 0 : index
    %15 = vector.load %arg1[%c3, %c0_15, %c0_16] : memref<9x3x4xf32, #tpu.memory_space<vmem>>, vector<1x3x4xf32>
    %16 = vector.shape_cast %15 : vector<1x3x4xf32> to vector<3x4xf32>
    %cst_17 = arith.constant dense<0.000000e+00> : vector<3x512xf32>
    %17 = tpu.matmul %16, %14, %cst_17 {dimension_numbers = #tpu.dot_dimension_numbers<[1], [0], [0], [1], [0, 0, 1, 1], [], []>} : vector<3x4xf32>, vector<4x512xf32>, vector<3x512xf32> -> vector<3x512xf32>
    %18 = arith.addf %13, %17 : vector<3x512xf32>
    %c0_18 = arith.constant 0 : index
    %c17 = arith.constant 17 : index
    %19 = vector.load %arg0[%c0_18, %c17] : memref<4x640xf32, #tpu.memory_space<vmem>>, vector<4x512xf32>
    %c4 = arith.constant 4 : index
    %c0_19 = arith.constant 0 : index
    %c0_20 = arith.constant 0 : index
    %20 = vector.load %arg1[%c4, %c0_19, %c0_20] : memref<9x3x4xf32, #tpu.memory_space<vmem>>, vector<1x3x4xf32>
    %21 = vector.shape_cast %20 : vector<1x3x4xf32> to vector<3x4xf32>
    %cst_21 = arith.constant dense<0.000000e+00> : vector<3x512xf32>
    %22 = tpu.matmul %21, %19, %cst_21 {dimension_numbers = #tpu.dot_dimension_numbers<[1], [0], [0], [1], [0, 0, 1, 1], [], []>} : vector<3x4xf32>, vector<4x512xf32>, vector<3x512xf32> -> vector<3x512xf32>
    %23 = arith.addf %18, %22 : vector<3x512xf32>
    %c0_22 = arith.constant 0 : index
    %c18 = arith.constant 18 : index
    %24 = vector.load %arg0[%c0_22, %c18] : memref<4x640xf32, #tpu.memory_space<vmem>>, vector<4x512xf32>
    %c5 = arith.constant 5 : index
    %c0_23 = arith.constant 0 : index
    %c0_24 = arith.constant 0 : index
    %25 = vector.load %arg1[%c5, %c0_23, %c0_24] : memref<9x3x4xf32, #tpu.memory_space<vmem>>, vector<1x3x4xf32>
    %26 = vector.shape_cast %25 : vector<1x3x4xf32> to vector<3x4xf32>
    %cst_25 = arith.constant dense<0.000000e+00> : vector<3x512xf32>
    %27 = tpu.matmul %26, %24, %cst_25 {dimension_numbers = #tpu.dot_dimension_numbers<[1], [0], [0], [1], [0, 0, 1, 1], [], []>} : vector<3x4xf32>, vector<4x512xf32>, vector<3x512xf32> -> vector<3x512xf32>
    %28 = arith.addf %23, %27 : vector<3x512xf32>
    %c0_26 = arith.constant 0 : index
    %c32 = arith.constant 32 : index
    %29 = vector.load %arg0[%c0_26, %c32] : memref<4x640xf32, #tpu.memory_space<vmem>>, vector<4x512xf32>
    %c6 = arith.constant 6 : index
    %c0_27 = arith.constant 0 : index
    %c0_28 = arith.constant 0 : index
    %30 = vector.load %arg1[%c6, %c0_27, %c0_28] : memref<9x3x4xf32, #tpu.memory_space<vmem>>, vector<1x3x4xf32>
    %31 = vector.shape_cast %30 : vector<1x3x4xf32> to vector<3x4xf32>
    %cst_29 = arith.constant dense<0.000000e+00> : vector<3x512xf32>
    %32 = tpu.matmul %31, %29, %cst_29 {dimension_numbers = #tpu.dot_dimension_numbers<[1], [0], [0], [1], [0, 0, 1, 1], [], []>} : vector<3x4xf32>, vector<4x512xf32>, vector<3x512xf32> -> vector<3x512xf32>
    %33 = arith.addf %28, %32 : vector<3x512xf32>
    %c0_30 = arith.constant 0 : index
    %c33 = arith.constant 33 : index
    %34 = vector.load %arg0[%c0_30, %c33] : memref<4x640xf32, #tpu.memory_space<vmem>>, vector<4x512xf32>
    %c7 = arith.constant 7 : index
    %c0_31 = arith.constant 0 : index
    %c0_32 = arith.constant 0 : index
    %35 = vector.load %arg1[%c7, %c0_31, %c0_32] : memref<9x3x4xf32, #tpu.memory_space<vmem>>, vector<1x3x4xf32>
    %36 = vector.shape_cast %35 : vector<1x3x4xf32> to vector<3x4xf32>
    %cst_33 = arith.constant dense<0.000000e+00> : vector<3x512xf32>
    %37 = tpu.matmul %36, %34, %cst_33 {dimension_numbers = #tpu.dot_dimension_numbers<[1], [0], [0], [1], [0, 0, 1, 1], [], []>} : vector<3x4xf32>, vector<4x512xf32>, vector<3x512xf32> -> vector<3x512xf32>
    %38 = arith.addf %33, %37 : vector<3x512xf32>
    %c0_34 = arith.constant 0 : index
    %c34 = arith.constant 34 : index
    %39 = vector.load %arg0[%c0_34, %c34] : memref<4x640xf32, #tpu.memory_space<vmem>>, vector<4x512xf32>
    %c8 = arith.constant 8 : index
    %c0_35 = arith.constant 0 : index
    %c0_36 = arith.constant 0 : index
    %40 = vector.load %arg1[%c8, %c0_35, %c0_36] : memref<9x3x4xf32, #tpu.memory_space<vmem>>, vector<1x3x4xf32>
    %41 = vector.shape_cast %40 : vector<1x3x4xf32> to vector<3x4xf32>
    %cst_37 = arith.constant dense<0.000000e+00> : vector<3x512xf32>
    %42 = tpu.matmul %41, %39, %cst_37 {dimension_numbers = #tpu.dot_dimension_numbers<[1], [0], [0], [1], [0, 0, 1, 1], [], []>} : vector<3x4xf32>, vector<4x512xf32>, vector<3x512xf32> -> vector<3x512xf32>
    %43 = arith.addf %38, %42 : vector<3x512xf32>
    %c0_38 = arith.constant 0 : index
    %c0_39 = arith.constant 0 : index
    %44 = vector.load %arg2[%c0_38, %c0_39] : memref<3x512xf32, #tpu.memory_space<vmem>>, vector<3x512xf32>
    tpu.vector_store %arg2[%c0_38, %c0_39], %43 {strides = array<i32>} : memref<3x512xf32, #tpu.memory_space<vmem>>, vector<3x512xf32>,
    return
  }
}

</mosaic_0001>

<bundles_post_ra>
// kernel: conv2d_pallas.1
= control target key start
LH: loop header
LB: loop body
LE: loop exit
PB: predicated region body
PF: predicated region fallthrough
CT: control target
= control target key end

     0   :  { %v1712_v3 = vmov 0.0   ;;  %s1713_s15 = smov 127   ;;  %s1714_s16 = smov 126   ;;  %vm34_vm0 = vcmask 1039360   ;;  %vm43_vm1 = vcmask 1043456   ;;  %vm39_vm2 = vcmask 31744   ;;  %s1939_s0 = inlined_call_operand.vmem [shape: f32[4,640], index: 0, kind: input, shape index: {}]   ;;  %s1940_s1 = inlined_call_operand.vmem [shape: f32[9,3,4], index: 1, kind: input, shape index: {}]   ;;  %s1941_s2 = inlined_call_operand.vmem [shape: f32[3,512], index: 2, kind: output, shape index: {}]  }
   0x1   :  { %v16_v0 = vld [vmem:[%s1939_s0 + $0x10] sm:$0xf]  ;;  %v1742_v1 = vld [vmem:[%s1939_s0 + $0x8] sm:$0xff]  ;;  %v1747_v2 = vld [vmem:[%s1939_s0] sm:$0xff]  ;;  %116 = vmatprep.mubr.f32.mxu0 %v1712_v3  ;;  %187 = vmatprep.mubr.f32.mxu1 %v1712_v3  ;;  %s1715_s19 = smov 112   ;;  %s1716_s22 = smov 111  }
   0x2   :  { %32 = vrot.lane.b32.xlu1 %v16_v0, %s1713_s15  ;;  %28 = vrot.lane.b32.xlu0 %v1742_v1, %s1713_s15  ;;  %v1754_v4 = vcombine.high %v1742_v1, %v1742_v1  ;;  %v1758_v5 = vcombine.high %v1747_v2, %v1747_v2  ;;  %v353_v6 = vld [vmem:[%s1939_s0 + $0x10] sm:$0xf]  ;;  %s1717_s25 = smov 110   ;;  %s1718_s28 = smov 96   ;;  %v1639_v20 = vld [vmem:[%s1940_s1 + $0x4] sm:$0x7] }
   0x3   :  { %v535_v7 = vld [vmem:[%s1939_s0 + $0x10] sm:$0xf]  ;;  %s1719_s3 = smov 95   ;;  %s1720_s6 = smov 94   ;;  %vm371_vm3 = vcmask 1031168   ;;  %vm553_vm4 = vcmask 916480  }
   0x4   :  { %v717_v8 = vld [vmem:[%s1939_s0 + $0x10] sm:$0xf]  ;;  %v13_v24 = vld [vmem:[%s1940_s1] sm:$0x7]  ;;  %v1652_v32 = vld [vmem:[%s1940_s1 + $0x8] sm:$0x7] }
   0x5   :  { %v899_v9 = vld [vmem:[%s1939_s0 + $0x10] sm:$0xf]  ;;  %v1659_v41 = vld [vmem:[%s1940_s1 + $0xc] sm:$0x7]  ;;  %vm735_vm5 = vcmask 908288   ;;  %vm917_vm6 = vcmask 900096  }
   0x6   :  { %30 = vrot.lane.b32.xlu1 %v1754_v4, %s1713_s15  ;;  %26 = vrot.lane.b32.xlu0 %v1758_v5, %s1713_s15  ;;  %v1081_v10 = vld [vmem:[%s1939_s0 + $0x10] sm:$0xf]  ;;  %v1673_v61 = vld [vmem:[%s1940_s1 + $0x14] sm:$0x7]  ;;  %vm1099_vm7 = vcmask 785408   ;;  %vm1281_vm8 = vcmask 777216  }
   0x7   :  { %v1263_v11 = vld [vmem:[%s1939_s0 + $0x10] sm:$0xf]  ;;  %vm1463_vm9 = vcmask 769024  }
   0x8   :  { %v1445_v12 = vld [vmem:[%s1939_s0 + $0x10] sm:$0xf] }
   0x9   :  { %v1666_v52 = vld [vmem:[%s1940_s1 + $0x10] sm:$0x7] }
   0xa   :  { %363 = vrot.lane.b32.xlu1 %v1758_v5, %s1714_s16  ;;  %24 = vrot.lane.b32.xlu0 %v1747_v2, %s1713_s15 }
   0xe   :  { %367 = vrot.lane.b32.xlu1 %v1754_v4, %s1714_s16  ;;  %365 = vrot.lane.b32.xlu0 %v1742_v1, %s1714_s16 }
  0x12   :  { %361 = vrot.lane.b32.xlu1 %v1747_v2, %s1714_s16  ;;  %369 = vrot.lane.b32.xlu0 %v353_v6, %s1714_s16 }
  0x16   :  { %547 = vrot.lane.b32.xlu1 %v1742_v1, %s1715_s19  ;;  %545 = vrot.lane.b32.xlu0 %v1758_v5, %s1715_s19 }
  0x1a   :  { %551 = vrot.lane.b32.xlu1 %v535_v7, %s1715_s19  ;;  %549 = vrot.lane.b32.xlu0 %v1754_v4, %s1715_s19  ;;  %v1680_v7 = vld [vmem:[%s1940_s1 + $0x18] sm:$0x7] }
  0x1e   :  { %727 = vrot.lane.b32.xlu1 %v1758_v5, %s1716_s22  ;;  %543 = vrot.lane.b32.xlu0 %v1747_v2, %s1715_s19 }
  0x22   :  { %731 = vrot.lane.b32.xlu1 %v1754_v4, %s1716_s22  ;;  %729 = vrot.lane.b32.xlu0 %v1742_v1, %s1716_s22 }
  0x26   :  { %725 = vrot.lane.b32.xlu1 %v1747_v2, %s1716_s22  ;;  %733 = vrot.lane.b32.xlu0 %v717_v8, %s1716_s22 }
  0x2a   :  { %911 = vrot.lane.b32.xlu1 %v1742_v1, %s1717_s25  ;;  %909 = vrot.lane.b32.xlu0 %v1758_v5, %s1717_s25 }
  0x2e   :  { %915 = vrot.lane.b32.xlu1 %v899_v9, %s1717_s25  ;;  %913 = vrot.lane.b32.xlu0 %v1754_v4, %s1717_s25 }
  0x32   :  { %1091 = vrot.lane.b32.xlu1 %v1758_v5, %s1718_s28  ;;  %907 = vrot.lane.b32.xlu0 %v1747_v2, %s1717_s25 }
  0x36   :  { %1095 = vrot.lane.b32.xlu1 %v1754_v4, %s1718_s28  ;;  %1093 = vrot.lane.b32.xlu0 %v1742_v1, %s1718_s28 }
  0x3a   :  { %1089 = vrot.lane.b32.xlu1 %v1747_v2, %s1718_s28  ;;  %1097 = vrot.lane.b32.xlu0 %v1081_v10, %s1718_s28 }
  0x3e   :  { %1275 = vrot.lane.b32.xlu1 %v1742_v1, %s1719_s3  ;;  %1273 = vrot.lane.b32.xlu0 %v1758_v5, %s1719_s3 }
  0x42   :  { %1279 = vrot.lane.b32.xlu1 %v1263_v11, %s1719_s3  ;;  %1277 = vrot.lane.b32.xlu0 %v1754_v4, %s1719_s3 }
  0x46   :  { %1455 = vrot.lane.b32.xlu1 %v1758_v5, %s1720_s6  ;;  %1271 = vrot.lane.b32.xlu0 %v1747_v2, %s1719_s3 }
  0x4a   :  { %1459 = vrot.lane.b32.xlu1 %v1754_v4, %s1720_s6  ;;  %1457 = vrot.lane.b32.xlu0 %v1742_v1, %s1720_s6 }
  0x4e   :  { %1453 = vrot.lane.b32.xlu1 %v1747_v2, %s1720_s6  ;;  %1461 = vrot.lane.b32.xlu0 %v1445_v12, %s1720_s6 }
  0x74   :  { %v33_v13 = vpop.permute.xlu1 %32  ;;  %v29_v14 = vpop.permute.xlu0 %28 }
  0x78   :  { %v31_v15 = vpop.permute.xlu1 %30  ;;  %v27_v16 = vpop.permute.xlu0 %26 }
  0x79   :  { %v36_v17 = vsel %vm34_vm0, %v27_v16, %v29_v14  ;;  %v38_v18 = vsel %vm34_vm0, %v31_v15, %v33_v13  ;;  %v37_v19 = vsel %vm34_vm0, %v29_v14, %v31_v15 }
  0x7a   :  { %1640 = vmatprep.subr.msk.mxu0 %vm43_vm1, %v36_v17  ;;  %1643 = vmatprep.subr.msk.mxu1 %vm43_vm1, %v38_v18  ;;  %v1687_v18 = vld [vmem:[%s1940_s1 + $0x1c] sm:$0x7] }
  0x7b   :  { %1644 = vmatpush1.msk.msra.mxu1 %vm43_vm1, %v37_v19 }
  0x7c   :  { %v364_v21 = vpop.permute.xlu1 %363  ;;  %v25_v22 = vpop.permute.xlu0 %24  ;;  %1645 = vmatmul.mubr.msk.f32.vlgmr.msra.gmra.mxu1 %vm39_vm2, %v1639_v20  ;;  %1649 = vmatprep.subr.msk.mxu1 %vm43_vm1, %v1754_v4 }
  0x7d   :  { %v35_v23 = vsel %vm34_vm0, %v25_v22, %v27_v16  ;;  %1650 = vmatpush1.msk.msra.mxu1 %vm43_vm1, %v1742_v1  ;;  %344 = vmatprep.mubr.f32.mxu1 %v1712_v3 }
  0x7e   :  { %1641 = vmatpush1.msk.msra.mxu0 %vm43_vm1, %v35_v23 }
  0x7f   :  { %1646 = vmatprep.subr.msk.mxu0 %vm43_vm1, %v1758_v5  ;;  %1642 = vmatmul.mubr.msk.f32.vlgmr.msra.gmra.mxu0 %vm39_vm2, %v1639_v20 }
  0x80   :  { %v368_v25 = vpop.permute.xlu1 %367  ;;  %v366_v26 = vpop.permute.xlu0 %365  ;;  %1647 = vmatpush1.msk.msra.mxu0 %vm43_vm1, %v1747_v2  ;;  %273 = vmatprep.mubr.f32.mxu0 %v1712_v3 }
  0x81   :  { %v373_v27 = vsel %vm371_vm3, %v364_v21, %v366_v26  ;;  %1651 = vmatmul.mubr.msk.f32.vlgmr.msra.gmra.mxu1 %vm39_vm2, %v13_v24  ;;  %v374_v33 = vsel %vm371_vm3, %v366_v26, %v368_v25 }
  0x82   :  { %1653 = vmatprep.subr.msk.mxu0 %vm43_vm1, %v373_v27  ;;  %522 = vmatprep.mubr.f32.mxu1 %v1712_v3  ;;  %v1694_v27 = vld [vmem:[%s1940_s1 + $0x20] sm:$0x7] }
  0x83   :  { %1648 = vmatmul.mubr.msk.f32.vlgmr.msra.gmra.mxu0 %vm39_vm2, %v13_v24 }
  0x84   :  { %v362_v28 = vpop.permute.xlu1 %361  ;;  %v370_v29 = vpop.permute.xlu0 %369  ;;  %451 = vmatprep.mubr.f32.mxu0 %v1712_v3 }
  0x85   :  { %v372_v30 = vsel %vm371_vm3, %v362_v28, %v364_v21  ;;  %v375_v31 = vsel %vm371_vm3, %v368_v25, %v370_v29 }
  0x86   :  { %1654 = vmatpush1.msk.msra.mxu0 %vm43_vm1, %v372_v30  ;;  %1656 = vmatprep.subr.msk.mxu1 %vm43_vm1, %v375_v31 }
  0x87   :  { %1657 = vmatpush1.msk.msra.mxu1 %vm43_vm1, %v374_v33  ;;  %1655 = vmatmul.mubr.msk.f32.vlgmr.msra.gmra.mxu0 %vm39_vm2, %v1652_v32 }
  0x88   :  { %v548_v34 = vpop.permute.xlu1 %547  ;;  %v546_v35 = vpop.permute.xlu0 %545  ;;  %1658 = vmatmul.mubr.msk.f32.vlgmr.msra.gmra.mxu1 %vm39_vm2, %v1652_v32  ;;  %633 = vmatprep.mubr.f32.mxu0 %v1712_v3 }
  0x89   :  { %v555_v36 = vsel %vm553_vm4, %v546_v35, %v548_v34  ;;  %704 = vmatprep.mubr.f32.mxu1 %v1712_v3 }
  0x8a   :  { %1660 = vmatprep.subr.msk.mxu0 %vm43_vm1, %v555_v36 }
  0x8c   :  { %v552_v37 = vpop.permute.xlu1 %551  ;;  %v550_v38 = vpop.permute.xlu0 %549 }
  0x8d   :  { %v556_v39 = vsel %vm553_vm4, %v548_v34, %v550_v38  ;;  %v557_v40 = vsel %vm553_vm4, %v550_v38, %v552_v37 }
  0x8e   :  { %1663 = vmatprep.subr.msk.mxu1 %vm43_vm1, %v557_v40 }
  0x8f   :  { %1664 = vmatpush1.msk.msra.mxu1 %vm43_vm1, %v556_v39 }
  0x90   :  { %v728_v42 = vpop.permute.xlu1 %727  ;;  %v544_v43 = vpop.permute.xlu0 %543  ;;  %1665 = vmatmul.mubr.msk.f32.vlgmr.msra.gmra.mxu1 %vm39_vm2, %v1659_v41 }
  0x91   :  { %v554_v44 = vsel %vm553_vm4, %v544_v43, %v546_v35  ;;  %886 = vmatprep.mubr.f32.mxu1 %v1712_v3 }
  0x92   :  { %1661 = vmatpush1.msk.msra.mxu0 %vm43_vm1, %v554_v44 }
  0x93   :  { %1662 = vmatmul.mubr.msk.f32.vlgmr.msra.gmra.mxu0 %vm39_vm2, %v1659_v41 }
  0x94   :  { %v732_v45 = vpop.permute.xlu1 %731  ;;  %v730_v46 = vpop.permute.xlu0 %729  ;;  %815 = vmatprep.mubr.f32.mxu0 %v1712_v3 }
  0x95   :  { %v737_v47 = vsel %vm735_vm5, %v728_v42, %v730_v46  ;;  %v738_v53 = vsel %vm735_vm5, %v730_v46, %v732_v45 }
  0x96   :  { %1667 = vmatprep.subr.msk.mxu0 %vm43_vm1, %v737_v47 }
  0x98   :  { %v726_v48 = vpop.permute.xlu1 %725  ;;  %v734_v49 = vpop.permute.xlu0 %733 }
  0x99   :  { %v736_v50 = vsel %vm735_vm5, %v726_v48, %v728_v42  ;;  %v739_v51 = vsel %vm735_vm5, %v732_v45, %v734_v49 }
  0x9a   :  { %1668 = vmatpush1.msk.msra.mxu0 %vm43_vm1, %v736_v50  ;;  %1670 = vmatprep.subr.msk.mxu1 %vm43_vm1, %v739_v51 }
  0x9b   :  { %1671 = vmatpush1.msk.msra.mxu1 %vm43_vm1, %v738_v53  ;;  %1669 = vmatmul.mubr.msk.f32.vlgmr.msra.gmra.mxu0 %vm39_vm2, %v1666_v52 }
  0x9c   :  { %v912_v54 = vpop.permute.xlu1 %911  ;;  %v910_v55 = vpop.permute.xlu0 %909  ;;  %1672 = vmatmul.mubr.msk.f32.vlgmr.msra.gmra.mxu1 %vm39_vm2, %v1666_v52  ;;  %997 = vmatprep.mubr.f32.mxu0 %v1712_v3 }
  0x9d   :  { %v919_v56 = vsel %vm917_vm6, %v910_v55, %v912_v54  ;;  %1068 = vmatprep.mubr.f32.mxu1 %v1712_v3 }
  0x9e   :  { %1674 = vmatprep.subr.msk.mxu0 %vm43_vm1, %v919_v56 }
  0xa0   :  { %v916_v57 = vpop.permute.xlu1 %915  ;;  %v914_v58 = vpop.permute.xlu0 %913 }
  0xa1   :  { %v920_v59 = vsel %vm917_vm6, %v912_v54, %v914_v58  ;;  %v921_v60 = vsel %vm917_vm6, %v914_v58, %v916_v57 }
  0xa2   :  { %1677 = vmatprep.subr.msk.mxu1 %vm43_vm1, %v921_v60 }
  0xa3   :  { %1678 = vmatpush1.msk.msra.mxu1 %vm43_vm1, %v920_v59 }
  0xa4   :  { %v1092_v62 = vpop.permute.xlu1 %1091  ;;  %v908_v63 = vpop.permute.xlu0 %907  ;;  %1679 = vmatmul.mubr.msk.f32.vlgmr.msra.gmra.mxu1 %vm39_vm2, %v1673_v61 }
  0xa5   :  { %v918_v0 = vsel %vm917_vm6, %v908_v63, %v910_v55  ;;  %1250 = vmatprep.mubr.f32.mxu1 %v1712_v3 }
  0xa6   :  { %1675 = vmatpush1.msk.msra.mxu0 %vm43_vm1, %v918_v0 }
  0xa7   :  { %1676 = vmatmul.mubr.msk.f32.vlgmr.msra.gmra.mxu0 %vm39_vm2, %v1673_v61 }
  0xa8   :  { %v1096_v1 = vpop.permute.xlu1 %1095  ;;  %v1094_v2 = vpop.permute.xlu0 %1093  ;;  %1179 = vmatprep.mubr.f32.mxu0 %v1712_v3 }
  0xa9   :  { %v1101_v4 = vsel %vm1099_vm7, %v1092_v62, %v1094_v2  ;;  %v1102_v10 = vsel %vm1099_vm7, %v1094_v2, %v1096_v1 }
  0xaa   :  { %1681 = vmatprep.subr.msk.mxu0 %vm43_vm1, %v1101_v4 }
  0xac   :  { %v1090_v5 = vpop.permute.xlu1 %1089  ;;  %v1098_v6 = vpop.permute.xlu0 %1097 }
  0xad   :  { %v1100_v8 = vsel %vm1099_vm7, %v1090_v5, %v1092_v62  ;;  %v1103_v9 = vsel %vm1099_vm7, %v1096_v1, %v1098_v6 }
  0xae   :  { %1682 = vmatpush1.msk.msra.mxu0 %vm43_vm1, %v1100_v8  ;;  %1684 = vmatprep.subr.msk.mxu1 %vm43_vm1, %v1103_v9 }
  0xaf   :  { %1683 = vmatmul.mubr.msk.f32.vlgmr.msra.gmra.mxu0 %vm39_vm2, %v1680_v7  ;;  %1685 = vmatpush1.msk.msra.mxu1 %vm43_vm1, %v1102_v10 }
  0xb0   :  { %v1276_v11 = vpop.permute.xlu1 %1275  ;;  %v1274_v12 = vpop.permute.xlu0 %1273  ;;  %1686 = vmatmul.mubr.msk.f32.vlgmr.msra.gmra.mxu1 %vm39_vm2, %v1680_v7  ;;  %1361 = vmatprep.mubr.f32.mxu0 %v1712_v3 }
  0xb1   :  { %v1283_v13 = vsel %vm1281_vm8, %v1274_v12, %v1276_v11  ;;  %1432 = vmatprep.mubr.f32.mxu1 %v1712_v3 }
  0xb2   :  { %1688 = vmatprep.subr.msk.mxu0 %vm43_vm1, %v1283_v13 }
  0xb4   :  { %v1280_v14 = vpop.permute.xlu1 %1279  ;;  %v1278_v15 = vpop.permute.xlu0 %1277 }
  0xb5   :  { %v1284_v16 = vsel %vm1281_vm8, %v1276_v11, %v1278_v15  ;;  %v1285_v17 = vsel %vm1281_vm8, %v1278_v15, %v1280_v14 }
  0xb6   :  { %1691 = vmatprep.subr.msk.mxu1 %vm43_vm1, %v1285_v17 }
  0xb7   :  { %1692 = vmatpush1.msk.msra.mxu1 %vm43_vm1, %v1284_v16 }
  0xb8   :  { %v1456_v19 = vpop.permute.xlu1 %1455  ;;  %v1272_v20 = vpop.permute.xlu0 %1271  ;;  %1693 = vmatmul.mubr.msk.f32.vlgmr.msra.gmra.mxu1 %vm39_vm2, %v1687_v18 }
  0xb9   :  { %v1282_v21 = vsel %vm1281_vm8, %v1272_v20, %v1274_v12  ;;  %1614 = vmatprep.mubr.f32.mxu1 %v1712_v3 }
  0xba   :  { %1689 = vmatpush1.msk.msra.mxu0 %vm43_vm1, %v1282_v21 }
  0xbb   :  { %1690 = vmatmul.mubr.msk.f32.vlgmr.msra.gmra.mxu0 %vm39_vm2, %v1687_v18 }
  0xbc   :  { %v1460_v22 = vpop.permute.xlu1 %1459  ;;  %v1458_v23 = vpop.permute.xlu0 %1457  ;;  %1543 = vmatprep.mubr.f32.mxu0 %v1712_v3 }
  0xbd   :  { %v1465_v24 = vsel %vm1463_vm9, %v1456_v19, %v1458_v23  ;;  %v1466_v30 = vsel %vm1463_vm9, %v1458_v23, %v1460_v22 }
  0xbe   :  { %1695 = vmatprep.subr.msk.mxu0 %vm43_vm1, %v1465_v24 }
  0xc0   :  { %v1454_v25 = vpop.permute.xlu1 %1453  ;;  %v1462_v26 = vpop.permute.xlu0 %1461 }
  0xc1   :  { %v1464_v28 = vsel %vm1463_vm9, %v1454_v25, %v1456_v19  ;;  %v1467_v29 = vsel %vm1463_vm9, %v1460_v22, %v1462_v26 }
  0xc2   :  { %1696 = vmatpush1.msk.msra.mxu0 %vm43_vm1, %v1464_v28  ;;  %1698 = vmatprep.subr.msk.mxu1 %vm43_vm1, %v1467_v29 }
  0xc3   :  { %1697 = vmatmul.mubr.msk.f32.vlgmr.msra.gmra.mxu0 %vm39_vm2, %v1694_v27  ;;  %1699 = vmatpush1.msk.msra.mxu1 %vm43_vm1, %v1466_v30 }
  0xc4   :  { %1700 = vmatmul.mubr.msk.f32.vlgmr.msra.gmra.mxu1 %vm39_vm2, %v1694_v27 }
 0x13c   :  { %v189_v31 = vpop.f32.mrf.mxu1 }
 0x13e   :  { %v191_v33 = vpop.f32.mrf.mxu1 }
 0x13f   :  { %v118_v3 = vpop.f32.mrf.mxu0 }
 0x141   :  { %v120_v32 = vpop.f32.mrf.mxu0  ;;  %v346_v35 = vpop.f32.mrf.mxu1 }
 0x142   :  { %v347_v53 = vadd.f32 %v346_v35, %v189_v31 }
 0x143   :  { %v275_v34 = vpop.f32.mrf.mxu0  ;;  %v348_v37 = vpop.f32.mrf.mxu1 }
 0x144   :  { %v276_v49 = vadd.f32 %v275_v34, %v118_v3  ;;  %v349_v54 = vadd.f32 %v348_v37, %v191_v33 }
 0x145   :  { %v277_v36 = vpop.f32.mrf.mxu0 }
 0x146   :  { %v278_v52 = vadd.f32 %v277_v36, %v120_v32 }
 0x147   :  { %v453_v38 = vpop.f32.mrf.mxu0 }
 0x148   :  { %v524_v39 = vpop.f32.mrf.mxu1  ;;  %v529_v55 = vadd.f32 %v453_v38, %v276_v49 }
 0x149   :  { %v455_v40 = vpop.f32.mrf.mxu0  ;;  %v531_v59 = vadd.f32 %v524_v39, %v347_v53 }
 0x14a   :  { %v526_v41 = vpop.f32.mrf.mxu1  ;;  %v530_v58 = vadd.f32 %v455_v40, %v278_v52 }
 0x14b   :  { %v532_v60 = vadd.f32 %v526_v41, %v349_v54 }
 0x150   :  { %v706_v43 = vpop.f32.mrf.mxu1 }
 0x151   :  { %v713_v2 = vadd.f32 %v706_v43, %v531_v59 }
 0x152   :  { %v708_v45 = vpop.f32.mrf.mxu1 }
 0x153   :  { %v635_v42 = vpop.f32.mrf.mxu0  ;;  %v714_v4 = vadd.f32 %v708_v45, %v532_v60 }
 0x154   :  { %v711_v61 = vadd.f32 %v635_v42, %v529_v55 }
 0x155   :  { %v637_v44 = vpop.f32.mrf.mxu0 }
 0x156   :  { %v712_v0 = vadd.f32 %v637_v44, %v530_v58 }
 0x15b   :  { %v817_v46 = vpop.f32.mrf.mxu0 }
 0x15c   :  { %v888_v47 = vpop.f32.mrf.mxu1  ;;  %v893_v5 = vadd.f32 %v817_v46, %v711_v61 }
 0x15d   :  { %v819_v48 = vpop.f32.mrf.mxu0  ;;  %v895_v9 = vadd.f32 %v888_v47, %v713_v2 }
 0x15e   :  { %v890_v50 = vpop.f32.mrf.mxu1  ;;  %v894_v7 = vadd.f32 %v819_v48, %v712_v0 }
 0x15f   :  { %v896_v10 = vadd.f32 %v890_v50, %v714_v4 }
 0x164   :  { %v1070_v56 = vpop.f32.mrf.mxu1 }
 0x165   :  { %v1077_v15 = vadd.f32 %v1070_v56, %v895_v9 }
 0x166   :  { %v1072_v62 = vpop.f32.mrf.mxu1 }
 0x167   :  { %v999_v51 = vpop.f32.mrf.mxu0  ;;  %v1078_v16 = vadd.f32 %v1072_v62, %v896_v10 }
 0x168   :  { %v1075_v12 = vadd.f32 %v999_v51, %v893_v5 }
 0x169   :  { %v1001_v57 = vpop.f32.mrf.mxu0 }
 0x16a   :  { %v1076_v14 = vadd.f32 %v1001_v57, %v894_v7 }
 0x16f   :  { %v1181_v63 = vpop.f32.mrf.mxu0 }
 0x170   :  { %v1252_v1 = vpop.f32.mrf.mxu1  ;;  %v1257_v18 = vadd.f32 %v1181_v63, %v1075_v12 }
 0x171   :  { %v1183_v6 = vpop.f32.mrf.mxu0  ;;  %v1259_v21 = vadd.f32 %v1252_v1, %v1077_v15 }
 0x172   :  { %v1254_v8 = vpop.f32.mrf.mxu1  ;;  %v1258_v19 = vadd.f32 %v1183_v6, %v1076_v14 }
 0x173   :  { %v1260_v22 = vadd.f32 %v1254_v8, %v1078_v16 }
 0x178   :  { %v1434_v13 = vpop.f32.mrf.mxu1 }
 0x179   :  { %v1441_v27 = vadd.f32 %v1434_v13, %v1259_v21 }
 0x17a   :  { %v1436_v20 = vpop.f32.mrf.mxu1 }
 0x17b   :  { %v1363_v11 = vpop.f32.mrf.mxu0  ;;  %v1442_v28 = vadd.f32 %v1436_v20, %v1260_v22 }
 0x17c   :  { %v1439_v24 = vadd.f32 %v1363_v11, %v1257_v18 }
 0x17d   :  { %v1365_v17 = vpop.f32.mrf.mxu0 }
 0x17e   :  { %v1440_v25 = vadd.f32 %v1365_v17, %v1258_v19 }
 0x183   :  { %v1545_v23 = vpop.f32.mrf.mxu0 }
 0x184   :  { %v1616_v26 = vpop.f32.mrf.mxu1  ;;  %v1621_v30 = vadd.f32 %v1545_v23, %v1439_v24 }
 0x185   :  { %v1547_v29 = vpop.f32.mrf.mxu0  ;;  %v1623_v32 = vadd.f32 %v1616_v26, %v1441_v27 }
 0x186   :  { %v1622_v3 = vadd.f32 %v1547_v29, %v1440_v25  ;;  %v1618_v31 = vpop.f32.mrf.mxu1 }
 0x187   :  { %v1624_v33 = vadd.f32 %v1618_v31, %v1442_v28 }
 0x188   :  { %v1629_v34 = vcombine.low %v1621_v30, %v1622_v3 }
 0x189   :  { %v1630_v35 = vcombine.low %v1623_v32, %v1624_v33 }
 0x18a   :  { %1633 = vst [vmem:[%s1941_s2] sm:$0x77] %v1629_v34 }
 0x18b   :  { %1634 = vst [vmem:[%s1941_s2 + $0x8] sm:$0x77] %v1630_v35 }

</bundles_post_ra>
